<compile_context>
chip_gen: v5e
topology: v5e:2x2
jax: 0.10.0
libtpu: 0.0.40
codegen_flags: <defaults>
</compile_context>

<pallas_src>
import functools

import jax
import jax.numpy as jnp
from jax.experimental import pallas as pl
from jax.experimental.pallas import tpu as pltpu


def _round_up(v, m):
    return ((v + m - 1) // m) * m


# ---------------------------------------------------------------------------
# Kernels
# ---------------------------------------------------------------------------
def _mean_fc_mask_kernel(x_ref, mask_ref, w_ref, b_ref, out_ref, acc_ref, cnt_ref):
    # x_ref:    (tb, ts, D)   mask_ref: (tb, ts, 1)
    # w_ref:    (D, C)        b_ref:    (1, C)
    # out_ref:  (tb, C)       acc_ref:  (tb, D) f32   cnt_ref: (tb, 1) f32
    s = pl.program_id(1)

    @pl.when(s == 0)
    def _init():
        acc_ref[...] = jnp.zeros_like(acc_ref)
        cnt_ref[...] = jnp.zeros_like(cnt_ref)

    x = x_ref[...].astype(jnp.float32)
    m = mask_ref[...].astype(jnp.float32)
    acc_ref[...] += jnp.sum(x * m, axis=1)      # (tb, D)
    cnt_ref[...] += jnp.sum(m, axis=1)          # (tb, 1)

    @pl.when(s == pl.num_programs(1) - 1)
    def _finalize():
        inv = pl.reciprocal(jnp.maximum(cnt_ref[...], 1e-9), approx=True)  # EUP
        pooled = acc_ref[...] * inv                                        # (tb, D)
        out_ref[...] = (
            jnp.dot(pooled, w_ref[...], preferred_element_type=jnp.float32)
            + b_ref[...]
        ).astype(out_ref.dtype)


def _mean_fc_nomask_kernel(x_ref, w_ref, b_ref, out_ref, acc_ref, *, inv_s):
    # Plain mean over the (unpadded) sequence length: scale by the static 1/S.
    s = pl.program_id(1)

    @pl.when(s == 0)
    def _init():
        acc_ref[...] = jnp.zeros_like(acc_ref)

    acc_ref[...] += jnp.sum(x_ref[...].astype(jnp.float32), axis=1)  # (tb, D)

    @pl.when(s == pl.num_programs(1) - 1)
    def _finalize():
        pooled = acc_ref[...] * inv_s
        out_ref[...] = (
            jnp.dot(pooled, w_ref[...], preferred_element_type=jnp.float32)
            + b_ref[...]
        ).astype(out_ref.dtype)


# ---------------------------------------------------------------------------
# Wrapper
# ---------------------------------------------------------------------------
def classifier_forward(x, w, b, mask=None, pooling="mean", *, tb=None, ts=None):
    """Pallas forward for Classifier.

    x:    (B, S, D)  float32 / bfloat16
    w:    (D, C)     float32   (transpose of PyTorch nn.Linear.weight)
    b:    (C,)       float32
    mask: (B, S) or None
    """
    B, S, D = x.shape
    C = w.shape[1]

    if pooling == "cls":
        # 'cls' pooling is a trivial slice + tiny matmul; done in glue JAX.
        return x[:, 0, :].astype(jnp.float32) @ w + b[None, :]

    # ----- tile selection (x block targets ~4 MiB so it pipelines on every gen) -----
    tb = 8 if tb is None else max(8, _round_up(tb, 8))
    if ts is None:
        rows = (4 << 20) // max(1, tb * D * x.dtype.itemsize)
        ts = max(8, (rows // 8) * 8)
    ts = max(8, _round_up(ts, 8))
    ts = min(ts, _round_up(S, 8))

    Bp = _round_up(B, tb)
    Sp = _round_up(S, ts)

    # Zero-pad so every block is full; padded rows contribute 0 to sums and counts.
    if (Bp, Sp) != (B, S):
        x = jnp.pad(x, ((0, Bp - B), (0, Sp - S), (0, 0)))

    grid = (Bp // tb, Sp // ts)
    b2 = b.reshape(1, C).astype(jnp.float32)

    x_spec = pl.BlockSpec((tb, ts, D), lambda bi, si: (bi, si, 0))
    w_spec = pl.BlockSpec((D, C), lambda bi, si: (0, 0))   # resident across S steps
    b_spec = pl.BlockSpec((1, C), lambda bi, si: (0, 0))
    out_spec = pl.BlockSpec((tb, C), lambda bi, si: (bi, 0))
    out_shape = jax.ShapeDtypeStruct((Bp, C), jnp.float32)

    compiler_params = pltpu.CompilerParams(
        dimension_semantics=("parallel", "arbitrary"),
        vmem_limit_bytes=32 * 1024 * 1024,
    )

    if mask is None:
        kernel = functools.partial(_mean_fc_nomask_kernel, inv_s=1.0 / float(S))
        out = pl.pallas_call(
            kernel,
            out_shape=out_shape,
            grid_spec=pltpu.PrefetchScalarGridSpec(
                num_scalar_prefetch=0,
                grid=grid,
                in_specs=[x_spec, w_spec, b_spec],
                out_specs=out_spec,
                scratch_shapes=[pltpu.VMEM((tb, D), jnp.float32)],
            ),
            compiler_params=compiler_params,
        )(x, w, b2)
    else:
        mask = mask.astype(x.dtype)
        if (Bp, Sp) != (B, S):
            mask = jnp.pad(mask, ((0, Bp - B), (0, Sp - S)))
        mask3 = mask.reshape(Bp, Sp, 1)
        m_spec = pl.BlockSpec((tb, ts, 1), lambda bi, si: (bi, si, 0))
        out = pl.pallas_call(
            _mean_fc_mask_kernel,
            out_shape=out_shape,
            grid_spec=pltpu.PrefetchScalarGridSpec(
                num_scalar_prefetch=0,
                grid=grid,
                in_specs=[x_spec, m_spec, w_spec, b_spec],
                out_specs=out_spec,
                scratch_shapes=[
                    pltpu.VMEM((tb, D), jnp.float32),
                    pltpu.VMEM((tb, 1), jnp.float32),
                ],
            ),
            compiler_params=compiler_params,
        )(x, mask3, w, b2)

    return out[:B]


# ---------------------------------------------------------------------------
# Self-test
# ---------------------------------------------------------------------------
if __name__ == "__main__":
    # Small shapes consistent with (batch, seq, d_model); S is deliberately not a
    # multiple of the sequence tile and B not a multiple of tb to exercise padding.
    B, S, D, C = 4, 50, 128, 16

    key = jax.random.PRNGKey(0)
    kx, km, kw, kb = jax.random.split(key, 4)

    x = jax.random.normal(kx, (B, S, D), dtype=jnp.float32)
    mask = (jax.random.uniform(km, (B, S)) > 0.3).astype(jnp.float32)
    mask = mask.at[:, 0].set(1.0)  # at least one valid position per row

    w = jax.random.normal(kw, (D, C), dtype=jnp.float32) * 0.02  # = weight.T
    b = jax.random.normal(kb, (C,), dtype=jnp.float32) * 0.02

    # Masked-mean path, with a small sequence tile so the reduction runs multiple
    # grid steps (tests the accumulator init/finalize logic).
    out = classifier_forward(x, w, b, mask=mask, pooling="mean", ts=16)
    out = jax.block_until_ready(out)

    m3 = mask[..., None]
    pooled_ref = (x * m3).sum(axis=1) / jnp.clip(m3.sum(axis=1), 1e-9, None)
    ref = pooled_ref @ w + b[None, :]
    assert out.shape == (B, C)
    # Relaxed tolerance because the in-kernel divide uses the EUP approx reciprocal.
    assert jnp.allclose(out, ref, atol=2e-3, rtol=2e-2), float(jnp.max(jnp.abs(out - ref)))

    # mask=None (plain mean) path with default tile sizes.
    out_nomask = jax.block_until_ready(
        classifier_forward(x, w, b, mask=None, pooling="mean")
    )
    ref_nomask = x.mean(axis=1) @ w + b[None, :]
    assert jnp.allclose(out_nomask, ref_nomask, atol=1e-4, rtol=1e-4), float(
        jnp.max(jnp.abs(out_nomask - ref_nomask))
    )

    print("KERNEL_OK")
</pallas_src>

<mosaic_0001>
module attributes {stable_mosaic.version = 11 : i64} {
  func.func @_mean_fc_mask_kernel(%arg0: i32, %arg1: i32, %arg2: memref<8x16x128xf32, #tpu.memory_space<vmem>>, %arg3: memref<8x16x1xf32, #tpu.memory_space<vmem>>, %arg4: memref<128x16xf32, #tpu.memory_space<vmem>>, %arg5: memref<1x16xf32, #tpu.memory_space<vmem>>, %arg6: memref<8x16xf32, #tpu.memory_space<vmem>>, %arg7: memref<8x128xf32, #tpu.memory_space<vmem>>, %arg8: memref<8x1xf32, #tpu.memory_space<vmem>>) attributes {dimension_semantics = [#tpu.dimension_semantics<parallel>, #tpu.dimension_semantics<arbitrary>], iteration_bounds = array<i64: 1, 4>, scalar_prefetch = 0 : i64, scratch_operands = 2 : i64, tpu.core_type = #tpu.core_type<tc>, window_params = [{transform_indices = @transform_0, window_bounds = array<i64: 8, 16, 128>}, {transform_indices = @transform_1, window_bounds = array<i64: 8, 16, 1>}, {pipeline_mode = #tpu.pipeline_mode<synchronous>, transform_indices = @transform_2, window_bounds = array<i64: 128, 16>}, {pipeline_mode = #tpu.pipeline_mode<synchronous>, transform_indices = @transform_3, window_bounds = array<i64: 1, 16>}, {transform_indices = @transform_4, window_bounds = array<i64: 8, 16>}]} {
    %c0_i32 = arith.constant 0 : i32
    %0 = arith.cmpi eq, %arg1, %c0_i32 : i32
    %1 = arith.extui %0 : i1 to i32
    %c0_i32_0 = arith.constant 0 : i32
    %2 = arith.cmpi ne, %1, %c0_i32_0 : i32
    scf.if %2 {
      %cst_16 = arith.constant 0.000000e+00 : f32
      %18 = vector.broadcast %cst_16 : f32 to vector<8x128xf32>
      %c0_17 = arith.constant 0 : index
      %c0_18 = arith.constant 0 : index
      %19 = vector.load %arg7[%c0_17, %c0_18] : memref<8x128xf32, #tpu.memory_space<vmem>>, vector<8x128xf32>
      tpu.vector_store %arg7[%c0_17, %c0_18], %18 {strides = array<i32>} : memref<8x128xf32, #tpu.memory_space<vmem>>, vector<8x128xf32>,
      %cst_19 = arith.constant 0.000000e+00 : f32
      %20 = vector.broadcast %cst_19 : f32 to vector<8x1xf32>
      %c0_20 = arith.constant 0 : index
      %c0_21 = arith.constant 0 : index
      %21 = vector.load %arg8[%c0_20, %c0_21] : memref<8x1xf32, #tpu.memory_space<vmem>>, vector<8x1xf32>
      tpu.vector_store %arg8[%c0_20, %c0_21], %20 {strides = array<i32>} : memref<8x1xf32, #tpu.memory_space<vmem>>, vector<8x1xf32>,
    } else {
    }
    %c0 = arith.constant 0 : index
    %c0_1 = arith.constant 0 : index
    %c0_2 = arith.constant 0 : index
    %3 = vector.load %arg2[%c0, %c0_1, %c0_2] : memref<8x16x128xf32, #tpu.memory_space<vmem>>, vector<8x16x128xf32>
    %c0_3 = arith.constant 0 : index
    %c0_4 = arith.constant 0 : index
    %c0_5 = arith.constant 0 : index
    %4 = vector.load %arg3[%c0_3, %c0_4, %c0_5] : memref<8x16x1xf32, #tpu.memory_space<vmem>>, vector<8x16x1xf32>
    %c0_6 = arith.constant 0 : index
    %c0_7 = arith.constant 0 : index
    %5 = vector.load %arg7[%c0_6, %c0_7] : memref<8x128xf32, #tpu.memory_space<vmem>>, vector<8x128xf32>
    %6 = vector.broadcast %4 : vector<8x16x1xf32> to vector<8x16x128xf32>
    %7 = arith.mulf %3, %6 : vector<8x16x128xf32>
    %cst = arith.constant dense<0.000000e+00> : vector<8x128xf32>
    %8 = vector.multi_reduction <add>, %7, %cst [1] : vector<8x16x128xf32> to vector<8x128xf32>
    %9 = arith.addf %5, %8 : vector<8x128xf32>
    %c0_8 = arith.constant 0 : index
    %c0_9 = arith.constant 0 : index
    %10 = vector.load %arg7[%c0_8, %c0_9] : memref<8x128xf32, #tpu.memory_space<vmem>>, vector<8x128xf32>
    tpu.vector_store %arg7[%c0_8, %c0_9], %9 {strides = array<i32>} : memref<8x128xf32, #tpu.memory_space<vmem>>, vector<8x128xf32>,
    %c0_10 = arith.constant 0 : index
    %c0_11 = arith.constant 0 : index
    %11 = vector.load %arg8[%c0_10, %c0_11] : memref<8x1xf32, #tpu.memory_space<vmem>>, vector<8x1xf32>
    %cst_12 = arith.constant dense<0.000000e+00> : vector<8x1xf32>
    %12 = vector.multi_reduction <add>, %4, %cst_12 [1] : vector<8x16x1xf32> to vector<8x1xf32>
    %13 = arith.addf %11, %12 : vector<8x1xf32>
    %c0_13 = arith.constant 0 : index
    %c0_14 = arith.constant 0 : index
    %14 = vector.load %arg8[%c0_13, %c0_14] : memref<8x1xf32, #tpu.memory_space<vmem>>, vector<8x1xf32>
    tpu.vector_store %arg8[%c0_13, %c0_14], %13 {strides = array<i32>} : memref<8x1xf32, #tpu.memory_space<vmem>>, vector<8x1xf32>,
    %c3_i32 = arith.constant 3 : i32
    %15 = arith.cmpi eq, %arg1, %c3_i32 : i32
    %16 = arith.extui %15 : i1 to i32
    %c0_i32_15 = arith.constant 0 : i32
    %17 = arith.cmpi ne, %16, %c0_i32_15 : i32
    scf.if %17 {
      %c0_16 = arith.constant 0 : index
      %c0_17 = arith.constant 0 : index
      %18 = vector.load %arg8[%c0_16, %c0_17] : memref<8x1xf32, #tpu.memory_space<vmem>>, vector<8x1xf32>
      %cst_18 = arith.constant 9.99999971E-10 : f32
      %19 = vector.broadcast %cst_18 : f32 to vector<8x1xf32>
      %20 = arith.maximumf %18, %19 : vector<8x1xf32>
      %21 = tpu.reciprocal %20 {approx = true} : vector<8x1xf32> -> vector<8x1xf32>
      %c0_19 = arith.constant 0 : index
      %c0_20 = arith.constant 0 : index
      %22 = vector.load %arg7[%c0_19, %c0_20] : memref<8x128xf32, #tpu.memory_space<vmem>>, vector<8x128xf32>
      %23 = vector.broadcast %21 : vector<8x1xf32> to vector<8x128xf32>
      %24 = arith.mulf %22, %23 : vector<8x128xf32>
      %c0_21 = arith.constant 0 : index
      %c0_22 = arith.constant 0 : index
      %25 = vector.load %arg4[%c0_21, %c0_22] : memref<128x16xf32, #tpu.memory_space<vmem>>, vector<128x16xf32>
      %cst_23 = arith.constant dense<0.000000e+00> : vector<8x16xf32>
      %26 = tpu.matmul %24, %25, %cst_23 {dimension_numbers = #tpu.dot_dimension_numbers<[1], [0], [0], [1], [0, 0, 1, 1], [], []>} : vector<8x128xf32>, vector<128x16xf32>, vector<8x16xf32> -> vector<8x16xf32>
      %c0_24 = arith.constant 0 : index
      %c0_25 = arith.constant 0 : index
      %27 = vector.load %arg5[%c0_24, %c0_25] : memref<1x16xf32, #tpu.memory_space<vmem>>, vector<1x16xf32>
      %28 = vector.broadcast %27 : vector<1x16xf32> to vector<8x16xf32>
      %29 = arith.addf %26, %28 : vector<8x16xf32>
      %c0_26 = arith.constant 0 : index
      %c0_27 = arith.constant 0 : index
      %30 = vector.load %arg6[%c0_26, %c0_27] : memref<8x16xf32, #tpu.memory_space<vmem>>, vector<8x16xf32>
      tpu.vector_store %arg6[%c0_26, %c0_27], %29 {strides = array<i32>} : memref<8x16xf32, #tpu.memory_space<vmem>>, vector<8x16xf32>,
    } else {
    }
    return
  }
  func.func @transform_0(%arg0: i32, %arg1: i32) -> (i32, i32, i32) {
    %c0_i32 = arith.constant 0 : i32
    %c0_i32_0 = arith.constant 0 : i32
    return %arg0, %arg1, %c0_i32 : i32, i32, i32
  }
  func.func @transform_1(%arg0: i32, %arg1: i32) -> (i32, i32, i32) {
    %c0_i32 = arith.constant 0 : i32
    %c0_i32_0 = arith.constant 0 : i32
    return %arg0, %arg1, %c0_i32 : i32, i32, i32
  }
  func.func @transform_2(%arg0: i32, %arg1: i32) -> (i32, i32) {
    %c0_i32 = arith.constant 0 : i32
    %c0_i32_0 = arith.constant 0 : i32
    %c0_i32_1 = arith.constant 0 : i32
    return %c0_i32, %c0_i32_0 : i32, i32
  }
  func.func @transform_3(%arg0: i32, %arg1: i32) -> (i32, i32) {
    %c0_i32 = arith.constant 0 : i32
    %c0_i32_0 = arith.constant 0 : i32
    %c0_i32_1 = arith.constant 0 : i32
    return %c0_i32, %c0_i32_0 : i32, i32
  }
  func.func @transform_4(%arg0: i32, %arg1: i32) -> (i32, i32) {
    %c0_i32 = arith.constant 0 : i32
    %c0_i32_0 = arith.constant 0 : i32
    return %arg0, %c0_i32 : i32, i32
  }
}

</mosaic_0001>

<bundles_post_ra>
// kernel: tpu_custom_call.1
= control target key start
LH: loop header
LB: loop body
LE: loop exit
PB: predicated region body
PF: predicated region fallthrough
CT: control target
= control target key end

     0   :  { %9 = vsyncpa [#allocation7], 0  ;;  %s1061_s15 = smov 0   ;;  %s1063_s16 = smov 0   ;;  %s1329_s0 = inlined_call_operand.vmem [shape: f32[8,64,128], index: 0, kind: input, shape index: {}]   ;;  %s1330_s1 = inlined_call_operand.vmem [shape: f32[8,64,1], index: 1, kind: input, shape index: {}]   ;;  %s1331_s2 = inlined_call_operand.vmem [shape: f32[128,16], index: 2, kind: input, shape index: {}]   ;;  %s1332_s3 = inlined_call_operand.vmem [shape: f32[1,16], index: 3, kind: input, shape index: {}]   ;;  %s1333_s4 = inlined_call_operand.hbm [shape: f32[8,16], index: 4, kind: output, shape index: {}]  }
   0x1   :  { %s1065_s17 = smov 0   ;;  %s1067_s18 = smov 0  }
   0x2   :  { %s1069_s19 = smov 0  }
   0x3 LB: > { %s883_s20 = sadd.s32 4294967295, %s1030_s19   ;;  %s24_s21 = sadd.s32 1, %s1026_s18  ;;  %s1030_s19 = sphi %s1069_s19, %s15_s19   ;;  %s1026_s18 = sphi %s1067_s18, %s1338_s18   ;;  %s1022_s17 = sphi %s1065_s17, %s1337_s17   ;;  %s1018_s16 = sphi %s1063_s16, %s1336_s16   ;;  %s1014_s15 = sphi %s1061_s15, %s1335_s15  }
   0x4   : > { %p25_p0 = scmp.ge.s32.totalorder %s24_s21, 4  ;;  %p43_p1 = scmp.ne.s32.totalorder %s1018_s16, %s1014_s15 }
   0x5   : > { %p44_p2 = scmp.eq.s32.totalorder %s1030_s19, 0  ;;  %s36_s24 = sadd.s32 1, %s1018_s16 }
   0x6   : > { %s1340_s21 = smov (%p25_p0, %s24_s21), 0  ;;  %p885_p5 = scmp.ge.s32.totalorder %s1030_s19, 4 }
   0x7   : > { %p1093_p3 = por %p44_p2, %p43_p1  ;;  %s32_s23 = ssub.s32 %s1026_s18, %s1340_s21 }
   0x8   : > { %p34_p4 = scmp.eq.s32.totalorder %s32_s23, 0  ;;  %171 = sbr.rel (%p885_p5) target bundleno = 53 (0x35), region = 24 }
   0xa   : > { %s1101_s25 = scalar_select %p34_p4, %s1018_s16, %s36_s24  }
   0xd   : > { %174 = sbr.rel (!%p1093_p3) target bundleno = 33 (0x21), region = 28  ;;  %s176_s26 = sand.u32 (%p1093_p3), 1, %s1018_s16  }
   0xe   : > { %s901_s27 = sshll.u32 (%p1093_p3), %s1026_s18, 4  ;;  %s886_s28 = sshll.u32 (%p1093_p3), %s176_s26, 7 }
   0xf   : > { %s1111_s5 = scalar_lea.vmem (%p1093_p3), %s1329_s0, %s901_s27  ;;  %s178_s6 = scalar_lea.vmem (%p1093_p3), [#allocation4], %s886_s28 }
  0x10   : > { %v243_v0 = vld [vmem:[%s1111_s5] sm:$0xff] (%p1093_p3)  ;;  %v245_v1 = vld [vmem:[%s1111_s5 + $0x8] sm:$0xff] (%p1093_p3) }
  0x11   : > { %v247_v2 = vld [vmem:[%s1111_s5 + $0x40] sm:$0xff] (%p1093_p3)  ;;  %244 = vst [vmem:[%s178_s6] sm:$0xff] (%p1093_p3), %v243_v0  ;;  %v249_v3 = vld [vmem:[%s1111_s5 + $0x48] sm:$0xff] (%p1093_p3) }
  0x12   : > { %246 = vst [vmem:[%s178_s6 + $0x8] sm:$0xff] %v245_v1  ;;  %v251_v4 = vld [vmem:[%s1111_s5 + $0x80] sm:$0xff]  ;;  %v253_v5 = vld [vmem:[%s1111_s5 + $0x88] sm:$0xff] }
  0x13   : > { %248 = vst [vmem:[%s178_s6 + $0x10] sm:$0xff] %v247_v2  ;;  %v255_v6 = vld [vmem:[%s1111_s5 + $0xc0] sm:$0xff]  ;;  %v257_v7 = vld [vmem:[%s1111_s5 + $0xc8] sm:$0xff] }
  0x14   : > { %250 = vst [vmem:[%s178_s6 + $0x18] sm:$0xff] %v249_v3  ;;  %v259_v8 = vld [vmem:[%s1111_s5 + $0x100] sm:$0xff]  ;;  %v261_v9 = vld [vmem:[%s1111_s5 + $0x108] sm:$0xff] }
  0x15   : > { %252 = vst [vmem:[%s178_s6 + $0x20] sm:$0xff] %v251_v4  ;;  %v263_v10 = vld [vmem:[%s1111_s5 + $0x140] sm:$0xff]  ;;  %v265_v11 = vld [vmem:[%s1111_s5 + $0x148] sm:$0xff] }
  0x16   : > { %254 = vst [vmem:[%s178_s6 + $0x28] sm:$0xff] %v253_v5  ;;  %v267_v12 = vld [vmem:[%s1111_s5 + $0x180] sm:$0xff]  ;;  %v269_v13 = vld [vmem:[%s1111_s5 + $0x188] sm:$0xff] }
  0x17   : > { %256 = vst [vmem:[%s178_s6 + $0x30] sm:$0xff] %v255_v6  ;;  %v271_v14 = vld [vmem:[%s1111_s5 + $0x1c0] sm:$0xff]  ;;  %v273_v15 = vld [vmem:[%s1111_s5 + $0x1c8] sm:$0xff] }
  0x18   : > { %258 = vst [vmem:[%s178_s6 + $0x38] sm:$0xff] %v257_v7 }
  0x19   : > { %260 = vst [vmem:[%s178_s6 + $0x40] sm:$0xff] %v259_v8 }
  0x1a   : > { %262 = vst [vmem:[%s178_s6 + $0x48] sm:$0xff] %v261_v9 }
  0x1b   : > { %264 = vst [vmem:[%s178_s6 + $0x50] sm:$0xff] %v263_v10 }
  0x1c   : > { %266 = vst [vmem:[%s178_s6 + $0x58] sm:$0xff] %v265_v11 }
  0x1d   : > { %268 = vst [vmem:[%s178_s6 + $0x60] sm:$0xff] %v267_v12 }
  0x1e   : > { %270 = vst [vmem:[%s178_s6 + $0x68] sm:$0xff] %v269_v13 }
  0x1f   : > { %272 = vst [vmem:[%s178_s6 + $0x70] sm:$0xff] %v271_v14 }
  0x20   : > { %274 = vst [vmem:[%s178_s6 + $0x78] sm:$0xff] %v273_v15 }
  0x21 PF: > { %280 = sbr.rel (!%p1093_p3) target bundleno = 53 (0x35), region = 66  ;;  %s282_s7 = sand.u32 (%p1093_p3), 1, %s1018_s16  }
  0x22   : > { %s902_s8 = sshll.u32 (%p1093_p3), %s1026_s18, 4  ;;  %s889_s9 = sshll.u32 (%p1093_p3), %s282_s7, 7 }
  0x23   : > { %s1136_s12 = scalar_lea.vmem (%p1093_p3), %s1330_s1, %s902_s8  ;;  %s284_s13 = scalar_lea.vmem (%p1093_p3), [#allocation5], %s889_s9 }
  0x24   : > { %v349_v16 = vld [vmem:[%s1136_s12] sm:$0xff] (%p1093_p3)  ;;  %v351_v17 = vld [vmem:[%s1136_s12 + $0x8] sm:$0xff] (%p1093_p3) }
  0x25   : > { %v353_v18 = vld [vmem:[%s1136_s12 + $0x40] sm:$0xff] (%p1093_p3)  ;;  %350 = vst [vmem:[%s284_s13] sm:$0xff] (%p1093_p3), %v349_v16  ;;  %v355_v19 = vld [vmem:[%s1136_s12 + $0x48] sm:$0xff] (%p1093_p3) }
  0x26   : > { %352 = vst [vmem:[%s284_s13 + $0x8] sm:$0xff] %v351_v17  ;;  %v357_v20 = vld [vmem:[%s1136_s12 + $0x80] sm:$0xff]  ;;  %v359_v21 = vld [vmem:[%s1136_s12 + $0x88] sm:$0xff] }
  0x27   : > { %354 = vst [vmem:[%s284_s13 + $0x10] sm:$0xff] %v353_v18  ;;  %v361_v22 = vld [vmem:[%s1136_s12 + $0xc0] sm:$0xff]  ;;  %v363_v23 = vld [vmem:[%s1136_s12 + $0xc8] sm:$0xff] }
  0x28   : > { %356 = vst [vmem:[%s284_s13 + $0x18] sm:$0xff] %v355_v19  ;;  %v365_v24 = vld [vmem:[%s1136_s12 + $0x100] sm:$0xff]  ;;  %v367_v25 = vld [vmem:[%s1136_s12 + $0x108] sm:$0xff] }
  0x29   : > { %358 = vst [vmem:[%s284_s13 + $0x20] sm:$0xff] %v357_v20  ;;  %v369_v26 = vld [vmem:[%s1136_s12 + $0x140] sm:$0xff]  ;;  %v371_v27 = vld [vmem:[%s1136_s12 + $0x148] sm:$0xff] }
  0x2a   : > { %360 = vst [vmem:[%s284_s13 + $0x28] sm:$0xff] %v359_v21  ;;  %v373_v28 = vld [vmem:[%s1136_s12 + $0x180] sm:$0xff]  ;;  %v375_v29 = vld [vmem:[%s1136_s12 + $0x188] sm:$0xff] }
  0x2b   : > { %362 = vst [vmem:[%s284_s13 + $0x30] sm:$0xff] %v361_v22  ;;  %v377_v30 = vld [vmem:[%s1136_s12 + $0x1c0] sm:$0xff]  ;;  %v379_v31 = vld [vmem:[%s1136_s12 + $0x1c8] sm:$0xff] }
  0x2c   : > { %364 = vst [vmem:[%s284_s13 + $0x38] sm:$0xff] %v363_v23 }
  0x2d   : > { %366 = vst [vmem:[%s284_s13 + $0x40] sm:$0xff] %v365_v24 }
  0x2e   : > { %368 = vst [vmem:[%s284_s13 + $0x48] sm:$0xff] %v367_v25 }
  0x2f   : > { %370 = vst [vmem:[%s284_s13 + $0x50] sm:$0xff] %v369_v26 }
  0x30   : > { %372 = vst [vmem:[%s284_s13 + $0x58] sm:$0xff] %v371_v27 }
  0x31   : > { %374 = vst [vmem:[%s284_s13 + $0x60] sm:$0xff] %v373_v28 }
  0x32   : > { %376 = vst [vmem:[%s284_s13 + $0x68] sm:$0xff] %v375_v29 }
  0x33   : > { %378 = vst [vmem:[%s284_s13 + $0x70] sm:$0xff] %v377_v30 }
  0x34   : > { %380 = vst [vmem:[%s284_s13 + $0x78] sm:$0xff] %v379_v31 }
  0x35 PF: > { %p892_p6 = scmp.ge.s32.totalorder %s1030_s19, 1  ;;  %p385_p7 = scmp.lt.s32.totalorder %s1030_s19, 5 }
  0x37   : > { %p386_p8 = pnand %p892_p6, %p385_p7 }
  0x38   : > { %s392_s14 = sand.u32 (!%p386_p8), 1, %s1014_s15   ;;  %p895_p9 = scmp.ne.s32.totalorder (!%p386_p8), %s1022_s17, 0 }
  0x39   : > { %389 = sbr.rel (%p386_p8) target bundleno = 510 (0x1fe), region = 104  ;;  %s893_s22 = sshll.u32 (!%p386_p8), %s392_s14, 7 }
  0x3a   : > { %s1157_s23 = scalar_lea.vmem (!%p386_p8), [#allocation4], %s893_s22  ;;  %s1159_s24 = scalar_lea.vmem (!%p386_p8), [#allocation5], %s893_s22 }
  0x3e   : > { %430 = sbr.rel (%p895_p9) target bundleno = 70 (0x46), region = 116 }
  0x43   : > { %vm432_vm0 = vcmask 7168   ;;  %v1032_v32 = vmov 0.0  }
  0x44   : > { %431 = vst [vmem:[#allocation2] sm:$0xff] %v1032_v32 }
  0x45   : > { %433 = vst.msk [vmem:[#allocation3] sm:$0xff] %vm432_vm0, %v1032_v32 }
  0x46 PF: > { %v454_v33 = vld [vmem:[%s1159_s24 + $0x20] sm:$0xff]  ;;  %vm645_vm1 = vcmask 7168   ;;  %v452_v34 = vld [vmem:[%s1159_s24 + $0x10] sm:$0xff]  ;;  %v1033_v36 = vmov 0   ;;  %v455_v40 = vld [vmem:[%s1159_s24 + $0x28] sm:$0xff]  ;;  %vm627_vm2 = vcmask 1041409  }
  0x47   : > { %v450_v35 = vld [vmem:[%s1159_s24] sm:$0xff]  ;;  %955 = vset.pattern.permute.xlu2 %v1033_v36  ;;  %954 = vset.pattern.permute.xlu1 %v1033_v36  ;;  %v664_v37 = vsel %vm645_vm1, %v454_v33, 0.0  ;;  %v655_v38 = vsel %vm645_vm1, %v452_v34, 0.0  ;;  %v453_v41 = vld [vmem:[%s1159_s24 + $0x18] sm:$0xff]  ;;  %v451_v42 = vld [vmem:[%s1159_s24 + $0x8] sm:$0xff]  ;;  %v665_v43 = vsel %vm645_vm1, %v455_v40, 0.0 }
  0x48   : > { %v646_v39 = vsel %vm645_vm1, %v450_v35, 0.0  ;;  %953 = vset.pattern.permute.xlu0 %v1033_v36  ;;  %489 = vperm.xlu2 %955, %v454_v33   ;;  %v656_v44 = vsel %vm645_vm1, %v453_v41, 0.0  ;;  %v647_v45 = vsel %vm645_vm1, %v451_v42, 0.0  ;;  %v1175_v46 = vld [vmem:[%s1159_s24 + $0x40] sm:$0xff]  ;;  %v666_v47 = vadd.f32 %v665_v43, %v664_v37  ;;  %v1178_v50 = vld [vmem:[%s1159_s24 + $0x38] sm:$0xff]  ;;  %v1181_v51 = vld [vmem:[%s1159_s24 + $0x30] sm:$0xff] }
  0x49   : > { %479 = vperm.xlu1 %954, %v452_v34   ;;  %469 = vperm.xlu0 %953, %v450_v35   ;;  %v657_v48 = vadd.f32 %v656_v44, %v655_v38  ;;  %v648_v49 = vadd.f32 %v647_v45, %v646_v39  ;;  %v1184_v52 = vld [vmem:[%s1159_s24 + $0x58] sm:$0xff]  ;;  %v682_v53 = vsel %vm645_vm1, %v1175_v46, 0.0  ;;  %v674_v54 = vsel %vm645_vm1, %v1178_v50, 0.0  ;;  %v1195_v61 = vld [vmem:[%s1159_s24 + $0x50] sm:$0xff]  ;;  %v1198_v62 = vld [vmem:[%s1159_s24 + $0x48] sm:$0xff]  ;;  %p896_p10 = scmp.ne.s32.totalorder %s1022_s17, 3 }
  0x4a   : > { %v673_v55 = vsel %vm645_vm1, %v1181_v51, 0.0  ;;  %v692_v56 = vsel %vm645_vm1, %v1184_v52, 0.0  ;;  %v667_v57 = vrot.slane %v666_v47, 4  ;;  %v691_v63 = vsel %vm645_vm1, %v1195_v61, 0.0  ;;  %v1205_v5 = vld [vmem:[%s1159_s24 + $0x68] sm:$0xff]  ;;  %v1210_v13 = vld [vmem:[%s1159_s24 + $0x60] sm:$0xff] }
  0x4b   : > { %v658_v58 = vrot.slane %v657_v48, 4  ;;  %v649_v59 = vrot.slane %v648_v49, 4  ;;  %v675_v60 = vadd.f32 %v674_v54, %v673_v55  ;;  %v683_v0 = vsel %vm645_vm1, %v1198_v62, 0.0  ;;  %v464_v21 = vld [vmem:[%s1159_s24 + $0x70] sm:$0xff]  ;;  %v465_v30 = vld [vmem:[%s1159_s24 + $0x78] sm:$0xff] }
  0x4c   : > { %v668_v1 = vadd.f32 %v667_v57, %v666_v47  ;;  %v693_v6 = vadd.f32 %v692_v56, %v691_v63  ;;  %v684_v7 = vadd.f32 %v683_v0, %v682_v53  ;;  %v701_v8 = vsel %vm645_vm1, %v1205_v5, 0.0 }
  0x4d   : > { %v659_v2 = vadd.f32 %v658_v58, %v657_v48  ;;  %v650_v3 = vadd.f32 %v649_v59, %v648_v49  ;;  %v676_v4 = vrot.slane %v675_v60, 4  ;;  %v700_v16 = vsel %vm645_vm1, %v1210_v13, 0.0 }
  0x4e   : > { %v669_v9 = vrot.slane %v668_v1, 2  ;;  %v694_v14 = vrot.slane %v693_v6, 4  ;;  %v685_v15 = vrot.slane %v684_v7, 4  ;;  %v709_v24 = vsel %vm645_vm1, %v464_v21, 0.0 }
  0x4f   : > { %v660_v10 = vrot.slane %v659_v2, 2  ;;  %v651_v11 = vrot.slane %v650_v3, 2  ;;  %v677_v12 = vadd.f32 %v676_v4, %v675_v60  ;;  %v702_v25 = vadd.f32 %v701_v8, %v700_v16  ;;  %v434_v16 = vld [vmem:[%s1157_s23] sm:$0xff] }
  0x50   : > { %494 = vperm.xlu2 %955, %v455_v40   ;;  %v670_v17 = vadd.f32 %v669_v9, %v668_v1  ;;  %v695_v22 = vadd.f32 %v694_v14, %v693_v6  ;;  %v686_v23 = vadd.f32 %v685_v15, %v684_v7  ;;  %v710_v34 = vsel %vm645_vm1, %v465_v30, 0.0 }
  0x51   : > { %484 = vperm.xlu1 %954, %v453_v41   ;;  %v661_v18 = vadd.f32 %v660_v10, %v659_v2  ;;  %474 = vperm.xlu0 %953, %v451_v42   ;;  %v652_v19 = vadd.f32 %v651_v11, %v650_v3  ;;  %v678_v20 = vrot.slane %v677_v12, 2  ;;  %v703_v33 = vrot.slane %v702_v25, 4  ;;  %v644_v2 = vld [vmem:[#allocation3] sm:$0xff]  ;;  %v436_v10 = vld [vmem:[%s1157_s23 + $0x10] sm:$0xff] }
  0x52   : > { %v671_v26 = vrot.slane %v670_v17, 1  ;;  %v696_v31 = vrot.slane %v695_v22, 2  ;;  %v687_v32 = vrot.slane %v686_v23, 2  ;;  %v711_v42 = vadd.f32 %v710_v34, %v709_v24  ;;  %v437_v11 = vld [vmem:[%s1157_s23 + $0x18] sm:$0xff]  ;;  %v443_v34 = vld [vmem:[%s1157_s23 + $0x48] sm:$0xff] }
  0x53   : > { %v662_v27 = vrot.slane %v661_v18, 1  ;;  %v653_v28 = vrot.slane %v652_v19, 1  ;;  %v679_v29 = vadd.f32 %v678_v20, %v677_v12  ;;  %v704_v41 = vadd.f32 %v703_v33, %v702_v25  ;;  %v435_v12 = vld [vmem:[%s1157_s23 + $0x8] sm:$0xff]  ;;  %v440_v20 = vld [vmem:[%s1157_s23 + $0x30] sm:$0xff] }
  0x54   : > { %v672_v35 = vadd.f32 %v671_v26, %v670_v17  ;;  %v697_v39 = vadd.f32 %v696_v31, %v695_v22  ;;  %v688_v40 = vadd.f32 %v687_v32, %v686_v23  ;;  %vm629_vm3 = vcmask 1042434   ;;  %v439_v22 = vld [vmem:[%s1157_s23 + $0x28] sm:$0xff]  ;;  %v445_v31 = vld [vmem:[%s1157_s23 + $0x58] sm:$0xff]  ;;  %v444_v33 = vld [vmem:[%s1157_s23 + $0x50] sm:$0xff] }
  0x55   : > { %v663_v36 = vadd.f32 %v662_v27, %v661_v18  ;;  %v654_v37 = vadd.f32 %v653_v28, %v652_v19  ;;  %v680_v38 = vrot.slane %v679_v29, 1  ;;  %vm631_vm4 = vcmask 1043459   ;;  %v441_v18 = vld [vmem:[%s1157_s23 + $0x38] sm:$0xff] }
  0x56   : > { %v698_v47 = vrot.slane %v697_v39, 1  ;;  %v689_v48 = vrot.slane %v688_v40, 1  ;;  %v705_v49 = vrot.slane %v704_v41, 2  ;;  %v712_v54 = vrot.slane %v711_v42, 4 }
  0x57   : > { %v726_v43 = vsel %vm627_vm2, %v663_v36, %v654_v37  ;;  %v681_v44 = vadd.f32 %v680_v38, %v679_v29  ;;  %vm633_vm5 = vcmask 1044484   ;;  %vm635_vm6 = vcmask 1045509  }
  0x58   : > { %v727_v45 = vsel %vm629_vm3, %v672_v35, %v726_v43  ;;  %509 = vperm.xlu2 %955, %v1175_v46   ;;  %v690_v55 = vadd.f32 %v689_v48, %v688_v40  ;;  %v706_v56 = vadd.f32 %v705_v49, %v704_v41  ;;  %v699_v57 = vadd.f32 %v698_v47, %v697_v39 }
  0x59   : > { %504 = vperm.xlu1 %954, %v1178_v50   ;;  %499 = vperm.xlu0 %953, %v1181_v51   ;;  %v728_v53 = vsel %vm631_vm4, %v681_v44, %v727_v45  ;;  %v713_v58 = vadd.f32 %v712_v54, %v711_v42  ;;  %vm637_vm7 = vcmask 1046534   ;;  %vm639_vm8 = vcmask 1047559  }
  0x5a   : > { %v729_v59 = vsel %vm633_vm5, %v690_v55, %v728_v53  ;;  %v707_v60 = vrot.slane %v706_v56, 1 }
  0x5b   : > { %v714_v63 = vrot.slane %v713_v58, 2  ;;  %v730_v0 = vsel %vm635_vm6, %v699_v57, %v729_v59  ;;  %v447_v57 = vld [vmem:[%s1157_s23 + $0x68] sm:$0xff] }
  0x5c   : > { %v708_v46 = vadd.f32 %v707_v60, %v706_v56 }
  0x5d   : > { %v715_v1 = vadd.f32 %v714_v63, %v713_v58  ;;  %v446_v63 = vld [vmem:[%s1157_s23 + $0x60] sm:$0xff] }
  0x5e   : > { %v731_v51 = vsel %vm637_vm7, %v708_v46, %v730_v0 }
  0x5f   : > { %v716_v50 = vrot.slane %v715_v1, 1 }
  0x60   : > { %524 = vperm.xlu2 %955, %v1184_v52  }
  0x61   : > { %519 = vperm.xlu1 %954, %v1195_v61   ;;  %514 = vperm.xlu0 %953, %v1198_v62   ;;  %v717_v3 = vadd.f32 %v716_v50, %v715_v1 }
  0x63   : > { %v732_v4 = vsel %vm639_vm8, %v717_v3, %v731_v51 }
  0x64   : > { %v734_v6 = vadd.f32 %v732_v4, %v644_v2 }
  0x66   : > { %735 = vst.msk [vmem:[#allocation3] sm:$0xff] %vm645_vm1, %v734_v6 }
  0x68   : > { %539 = vperm.xlu2 %955, %v464_v21   ;;  %v438_v21 = vld [vmem:[%s1157_s23 + $0x20] sm:$0xff] }
  0x69   : > { %534 = vperm.xlu1 %954, %v1205_v5   ;;  %529 = vperm.xlu0 %953, %v1210_v13  }
  0x71   : > { %544 = vperm.xlu0 %953, %v465_v30   ;;  %v442_v30 = vld [vmem:[%s1157_s23 + $0x40] sm:$0xff] }
  0xa2   : > { %v490_v52 = vpop.permute.xlu2 %489 }
  0xa3   : > { %v551_v28 = vmul.f32 %v490_v52, %v438_v21 }
  0xaa   : > { %v495_v7 = vpop.permute.xlu2 %494 }
  0xab   : > { %v552_v29 = vmul.f32 %v495_v7, %v439_v22 }
  0xad   : > { %v577_v38 = vadd.f32 %v552_v29, %v551_v28 }
  0xaf   : > { %v578_v54 = vrot.slane %v577_v38, 4 }
  0xb1   : > { %v579_v46 = vadd.f32 %v578_v54, %v577_v38 }
  0xb2   : > { %v510_v14 = vpop.permute.xlu2 %509 }
  0xb3   : > { %v555_v41 = vmul.f32 %v510_v14, %v442_v30 }
  0xba   : > { %v525_v35 = vpop.permute.xlu2 %524 }
  0xbb   : > { %v480_v61 = vpop.permute.xlu1 %479  ;;  %v470_v62 = vpop.permute.xlu0 %469  ;;  %v558_v42 = vmul.f32 %v525_v35, %v445_v31 }
  0xbc   : > { %v549_v15 = vmul.f32 %v480_v61, %v436_v10  ;;  %v547_v23 = vmul.f32 %v470_v62, %v434_v16  ;;  %v580_v61 = vrot.slane %v579_v46, 2 }
  0xc3   : > { %v485_v8 = vpop.permute.xlu1 %484  ;;  %v475_v9 = vpop.permute.xlu0 %474 }
  0xc4   : > { %v550_v5 = vmul.f32 %v485_v8, %v437_v11  ;;  %v548_v13 = vmul.f32 %v475_v9, %v435_v12  ;;  %v540_v8 = vpop.permute.xlu2 %539  ;;  %v448_v9 = vld [vmem:[%s1157_s23 + $0x70] sm:$0xff]  ;;  %v449_v12 = vld [vmem:[%s1157_s23 + $0x78] sm:$0xff] }
  0xc6   : > { %v570_v24 = vadd.f32 %v550_v5, %v549_v15  ;;  %v563_v25 = vadd.f32 %v548_v13, %v547_v23  ;;  %v581_v5 = vadd.f32 %v580_v61, %v579_v46 }
  0xc8   : > { %v571_v32 = vrot.slane %v570_v24, 4  ;;  %v564_v36 = vrot.slane %v563_v25, 4 }
  0xca   : > { %v572_v45 = vadd.f32 %v571_v32, %v570_v24  ;;  %v565_v47 = vadd.f32 %v564_v36, %v563_v25 }
  0xcb   : > { %v505_v17 = vpop.permute.xlu1 %504  ;;  %v500_v19 = vpop.permute.xlu0 %499 }
  0xcc   : > { %v554_v26 = vmul.f32 %v505_v17, %v441_v18  ;;  %v553_v27 = vmul.f32 %v500_v19, %v440_v20  ;;  %v573_v56 = vrot.slane %v572_v45, 2  ;;  %v566_v58 = vrot.slane %v565_v47, 2 }
  0xcd   : > { %v561_v19 = vmul.f32 %v540_v8, %v448_v9 }
  0xce   : > { %v584_v37 = vadd.f32 %v554_v26, %v553_v27  ;;  %v574_v2 = vadd.f32 %v573_v56, %v572_v45  ;;  %v567_v4 = vadd.f32 %v566_v58, %v565_v47  ;;  %v582_v27 = vrot.slane %v581_v5, 1 }
  0xd0   : > { %v585_v48 = vrot.slane %v584_v37, 4  ;;  %v575_v10 = vrot.slane %v574_v2, 1  ;;  %v568_v14 = vrot.slane %v567_v4, 1  ;;  %v583_v35 = vadd.f32 %v582_v27, %v581_v5 }
  0xd2   : > { %v586_v59 = vadd.f32 %v585_v48, %v584_v37  ;;  %v576_v21 = vadd.f32 %v575_v10, %v574_v2  ;;  %v569_v23 = vadd.f32 %v568_v14, %v567_v4  ;;  %v466_v48 = vld [vmem:[#allocation2] sm:$0xff] }
  0xd3   : > { %v520_v39 = vpop.permute.xlu1 %519  ;;  %v515_v40 = vpop.permute.xlu0 %514 }
  0xd4   : > { %v557_v43 = vmul.f32 %v520_v39, %v444_v33  ;;  %v556_v44 = vmul.f32 %v515_v40, %v443_v34  ;;  %v587_v6 = vrot.slane %v586_v59, 2  ;;  %v628_v31 = vsel %vm627_vm2, %v576_v21, %v569_v23 }
  0xd5   : > { %v630_v39 = vsel %vm629_vm3, %v583_v35, %v628_v31 }
  0xd6   : > { %v598_v49 = vadd.f32 %v558_v42, %v557_v43  ;;  %v591_v53 = vadd.f32 %v556_v44, %v555_v41  ;;  %v588_v15 = vadd.f32 %v587_v6, %v586_v59 }
  0xd8   : > { %v592_v55 = vrot.slane %v591_v53, 4  ;;  %v599_v60 = vrot.slane %v598_v49, 4  ;;  %v589_v24 = vrot.slane %v588_v15, 1 }
  0xda   : > { %v593_v0 = vadd.f32 %v592_v55, %v591_v53  ;;  %v600_v52 = vadd.f32 %v599_v60, %v598_v49  ;;  %v590_v32 = vadd.f32 %v589_v24, %v588_v15 }
  0xdb   : > { %v535_v1 = vpop.permute.xlu1 %534  ;;  %v530_v50 = vpop.permute.xlu0 %529 }
  0xdc   : > { %v560_v51 = vmul.f32 %v535_v1, %v447_v57  ;;  %v559_v3 = vmul.f32 %v530_v50, %v446_v63  ;;  %v594_v62 = vrot.slane %v593_v0, 2  ;;  %v601_v16 = vrot.slane %v600_v52, 2 }
  0xdd   : > { %v632_v40 = vsel %vm631_vm4, %v590_v32, %v630_v39 }
  0xde   : > { %v605_v7 = vadd.f32 %v560_v51, %v559_v3  ;;  %v595_v13 = vadd.f32 %v594_v62, %v593_v0  ;;  %v602_v25 = vadd.f32 %v601_v16, %v600_v52 }
  0xe0   : > { %v606_v11 = vrot.slane %v605_v7, 4  ;;  %v596_v28 = vrot.slane %v595_v13, 1  ;;  %v603_v33 = vrot.slane %v602_v25, 1 }
  0xe2   : > { %v607_v17 = vadd.f32 %v606_v11, %v605_v7  ;;  %v597_v36 = vadd.f32 %v596_v28, %v595_v13  ;;  %v604_v41 = vadd.f32 %v603_v33, %v602_v25 }
  0xe3   : > { %v545_v18 = vpop.permute.xlu0 %544 }
  0xe4   : > { %v562_v20 = vmul.f32 %v545_v18, %v449_v12  ;;  %v608_v22 = vrot.slane %v607_v17, 2  ;;  %v634_v43 = vsel %vm633_vm5, %v597_v36, %v632_v40 }
  0xe5   : > { %v636_v47 = vsel %vm635_vm6, %v604_v41, %v634_v43 }
  0xe6   : > { %v612_v26 = vadd.f32 %v562_v20, %v561_v19  ;;  %v609_v29 = vadd.f32 %v608_v22, %v607_v17 }
  0xe8   : > { %v613_v30 = vrot.slane %v612_v26, 4  ;;  %v610_v37 = vrot.slane %v609_v29, 1 }
  0xea   : > { %v614_v34 = vadd.f32 %v613_v30, %v612_v26  ;;  %v611_v44 = vadd.f32 %v610_v37, %v609_v29 }
  0xec   : > { %v615_v38 = vrot.slane %v614_v34, 2  ;;  %v638_v53 = vsel %vm637_vm7, %v611_v44, %v636_v47 }
  0xee   : > { %v616_v42 = vadd.f32 %v615_v38, %v614_v34 }
  0xf0   : > { %v617_v45 = vrot.slane %v616_v42, 1 }
  0xf2   : > { %v618_v49 = vadd.f32 %v617_v45, %v616_v42 }
  0xf3   : > { %739 = sbr.rel (%p896_p10) target bundleno = 504 (0x1f8), region = 120 }
  0xf4   : > { %v640_v54 = vsel %vm639_vm8, %v618_v49, %v638_v53 }
  0xf5   : > { %v642_v55 = vadd.f32 %v640_v54, %v466_v48 }
  0xf7   : > { %643 = vst [vmem:[#allocation2] sm:$0xff] %v642_v55 }
  0xf8   : > { %v740_v56 = vld [vmem:[#allocation3] sm:$0xff]  ;;  %v765_v57 = vld [vmem:[%s1331_s2 + $0x78] sm:$0xff]  ;;  %v764_v58 = vld [vmem:[%s1331_s2 + $0x70] sm:$0xff]  ;;  %v1034_v59 = vmov 0   ;;  %vm790_vm9 = vcmask 130048  }
  0xf9   : > { %956 = vset.pattern.permute.xlu0 %v1034_v59  ;;  %v741_v60 = vmax.f32 %v740_v56, 1e-09  ;;  %770 = vmatpush.msra.mxu0 %v765_v57  ;;  %v763_v63 = vld [vmem:[%s1331_s2 + $0x68] sm:$0xff]  ;;  %v762_v46 = vld [vmem:[%s1331_s2 + $0x60] sm:$0xff]  ;;  %v761_v0 = vld [vmem:[%s1331_s2 + $0x58] sm:$0xff] }
  0xfa   : > { %v760_v1 = vld [vmem:[%s1331_s2 + $0x50] sm:$0xff]  ;;  %v759_v51 = vld [vmem:[%s1331_s2 + $0x48] sm:$0xff]  ;;  %v758_v2 = vld [vmem:[%s1331_s2 + $0x40] sm:$0xff] }
  0xfb   : > { %958 = vrcp.f32 %v741_v60  ;;  %771 = vmatpush.msra.mxu0 %v764_v58  ;;  %v757_v3 = vld [vmem:[%s1331_s2 + $0x38] sm:$0xff]  ;;  %v756_v4 = vld [vmem:[%s1331_s2 + $0x30] sm:$0xff]  ;;  %v755_v6 = vld [vmem:[%s1331_s2 + $0x28] sm:$0xff] }
  0xfc   : > { %v754_v52 = vld [vmem:[%s1331_s2 + $0x20] sm:$0xff]  ;;  %v753_v61 = vld [vmem:[%s1331_s2 + $0x18] sm:$0xff]  ;;  %v752_v62 = vld [vmem:[%s1331_s2 + $0x10] sm:$0xff] }
  0xfd   : > { %772 = vmatpush.msra.mxu0 %v763_v63  ;;  %v751_v7 = vld [vmem:[%s1331_s2 + $0x8] sm:$0xff]  ;;  %v750_v8 = vld [vmem:[%s1331_s2] sm:$0xff] }
  0xfe   : > { %v743_v9 = vld [vmem:[#allocation2] sm:$0xff] }
  0xff   : > { %773 = vmatpush.msra.mxu0 %v762_v46  ;;  %v957_v12 = vld [vmem:[%s1332_s3] ss:$0 sm:$0xff] }
 0x101   : > { %v959_v50 = vpop.eup %958  ;;  %774 = vmatpush.msra.mxu0 %v761_v0 }
 0x102   : > { %746 = vperm.xlu0 %956, %v959_v50  }
 0x103   : > { %775 = vmatpush.msra.mxu0 %v760_v1 }
 0x105   : > { %776 = vmatpush.msra.mxu0 %v759_v51 }
 0x107   : > { %777 = vmatpush.msra.mxu0 %v758_v2 }
 0x109   : > { %778 = vmatpush.msra.mxu0 %v757_v3 }
 0x10b   : > { %779 = vmatpush.msra.mxu0 %v756_v4 }
 0x10d   : > { %780 = vmatpush.msra.mxu0 %v755_v6 }
 0x10f   : > { %781 = vmatpush.msra.mxu0 %v754_v52 }
 0x111   : > { %782 = vmatpush.msra.mxu0 %v753_v61 }
 0x113   : > { %783 = vmatpush.msra.mxu0 %v752_v62 }
 0x115   : > { %784 = vmatpush.msra.mxu0 %v751_v7 }
 0x117   : > { %785 = vmatpush.msra.mxu0 %v750_v8 }
 0x174   : > { %v747_v10 = vpop.permute.xlu0 %746 }
 0x175   : > { %v749_v11 = vmul.f32 %v747_v10, %v743_v9 }
 0x177   : > { %786 = vmatmul.f32.vlgmr.msra.gmra.mxu0 %v749_v11 }
 0x1f4   : > { %v787_v14 = vpop.f32.mrf.mxu0 }
 0x1f5   : > { %v788_v15 = vadd.f32 %v957_v12, %v787_v14 }
 0x1f7   : > { %791 = vst.msk [vmem:[#allocation6] sm:$0xff] %vm790_vm9, %v788_v15 }
 0x1f8 PF: > { %p907_p11 = scmp.eq.s32.totalorder %s883_s20, 3  ;;  %s802_s14 = sshll.u32 %s1333_s4, 4  ;;  %s803_s14 = int_to_ptr.hbm [resolvable:$true] %s802_s14 }
 0x1f9   : > { %s1035_s22 = smov [#allocation6]  }
 0x1fa   : > { %s800_s23 = sshll.u32 %s1035_s22, 4  ;;  %s801_s23 = int_to_ptr.vmem [resolvable:$true] %s800_s23 }
 0x1fb   : > { %904 = dma.vmem_to_hbm [thread:$0]  (%p907_p11), %s801_s23, 128, %s803_s14, [#allocation7]  }
 0x1fc   : > { %1009 = dma.done.wait (%p907_p11), [#allocation7], 128  }
 0x1fd   : > { %1011 = vsyncadd (%p907_p11), [#allocation7], 4294967168 }
 0x1fe PF: > { %s15_s19 = sadd.s32 1, %s1030_s19   ;;  %s1335_s15 = smov %s1018_s16 }
 0x1ff   : > { %p12_p12 = scmp.ge.s32.totalorder %s15_s19, 6   ;;  %s1336_s16 = smov %s1101_s25 }
 0x200   : > { %s1337_s17 = smov %s1026_s18  ;;  %s1338_s18 = smov %s1340_s21 }
 0x201   :  { %14 = sbr.rel (!%p12_p12) target bundleno = 3 (0x3), region = 161 }
 0x206   :  { %816 = vsyncpa [#allocation7], 1 }
 0x207   :  { %818 = vsyncpa [#allocation7 + $0x1], 1 }

</bundles_post_ra>
